<compile_context>
chip_gen: v7x
topology: tpu7x:2x2x1
jax: 0.10.0
libtpu: 0.0.40
codegen_flags: <defaults>
</compile_context>

<pallas_src>
import jax
import jax.numpy as jnp
from jax.experimental import pallas as pl
from jax.experimental.pallas import tpu as pltpu

_LANE = 128
_SUBLANE = 8


def _round_up(n, m):
    return ((n + m - 1) // m) * m


def two_layer_kernel(x_ref, w1_ref, b1_ref, w2_ref, b2_ref, o_ref):
    # Layer 1: bf16 MXU matmul with f32 accumulation; bias + ReLU in f32 on the VPU.
    h = jnp.dot(x_ref[...], w1_ref[...], preferred_element_type=jnp.float32)
    h = jnp.maximum(h + b1_ref[...], 0.0)            # (TB, Hp) + (1, Hp) broadcast
    # Layer 2: cast activations to bf16 for the MXU, accumulate in f32.
    y = jnp.dot(h.astype(jnp.bfloat16), w2_ref[...], preferred_element_type=jnp.float32)
    y = y + b2_ref[...]                              # (TB, Op) + (1, Op) broadcast
    # Lane-dense (multiple-of-128) f32 store; sigmoid's exp runs on the EUP.
    o_ref[...] = jax.nn.sigmoid(y)


def two_layer_forward(x, w1, b1, w2, b2, *, tb=128):
    """x: (B, D_in); w1: (D_in, H); b1: (H,); w2: (H, D_out); b2: (D_out,).

    Weights are stored pre-transposed as (in_features, out_features) so the kernel
    computes y = x @ W + b directly (same math as PyTorch's x @ W.T with its
    (out, in) storage).
    """
    B, D_in = x.shape
    H = w1.shape[1]
    D_out = w2.shape[1]

    # Pad MXU contraction / lane dims to 128 and batch to a multiple of the tile.
    d_in_p = _round_up(max(D_in, 1), _LANE)
    h_p = _round_up(max(H, 1), _LANE)
    d_out_p = _round_up(max(D_out, 1), _LANE)
    tb = min(tb, _round_up(B, _SUBLANE))
    b_p = _round_up(B, tb)

    # Zero-pad (exactness argued in the header comment). bf16 for matmul operands,
    # f32 for biases so elementwise math stays f32.
    xp = jnp.zeros((b_p, d_in_p), jnp.bfloat16).at[:B, :D_in].set(x.astype(jnp.bfloat16))
    w1p = jnp.zeros((d_in_p, h_p), jnp.bfloat16).at[:D_in, :H].set(w1.astype(jnp.bfloat16))
    b1p = jnp.zeros((1, h_p), jnp.float32).at[:, :H].set(b1.reshape(1, -1).astype(jnp.float32))
    w2p = jnp.zeros((h_p, d_out_p), jnp.bfloat16).at[:H, :D_out].set(w2.astype(jnp.bfloat16))
    b2p = jnp.zeros((1, d_out_p), jnp.float32).at[:, :D_out].set(b2.reshape(1, -1).astype(jnp.float32))

    grid = (pl.cdiv(b_p, tb),)

    cost = pl.CostEstimate(
        flops=2 * b_p * (d_in_p * h_p + h_p * d_out_p),
        transcendentals=b_p * d_out_p,                      # sigmoid exp
        bytes_accessed=(xp.size * 2 + w1p.size * 2 + w2p.size * 2
                        + b1p.size * 4 + b2p.size * 4 + b_p * d_out_p * 4),
    )

    out = pl.pallas_call(
        two_layer_kernel,
        out_shape=jax.ShapeDtypeStruct((b_p, d_out_p), jnp.float32),
        grid=grid,
        in_specs=[
            pl.BlockSpec((tb, d_in_p), lambda i: (i, 0)),      # batch-tiled input
            pl.BlockSpec((d_in_p, h_p), lambda i: (0, 0)),     # VMEM-resident weights
            pl.BlockSpec((1, h_p), lambda i: (0, 0)),
            pl.BlockSpec((h_p, d_out_p), lambda i: (0, 0)),
            pl.BlockSpec((1, d_out_p), lambda i: (0, 0)),
        ],
        out_specs=pl.BlockSpec((tb, d_out_p), lambda i: (i, 0)),
        compiler_params=pltpu.CompilerParams(
            dimension_semantics=("parallel",),                 # shard tiles across v7x's 2 TCs
            vmem_limit_bytes=32 * 1024 * 1024,                 # fits v7x (64 MiB phys) with headroom
        ),
        cost_estimate=cost,
    )(xp, w1p, b1p, w2p, b2p)

    return out[:B, :D_out]


def reference_forward(x, w1, b1, w2, b2):
    h = jnp.maximum(x @ w1 + b1, 0.0)
    return jax.nn.sigmoid(h @ w2 + b2)


if __name__ == "__main__":
    # TwoLayer(input_dim=32, hidden_dim=64, output_dim=16); batch=256 so the
    # batch-tiled grid has multiple steps to pipeline.
    batch, input_dim, hidden_dim, output_dim = 256, 32, 64, 16

    key = jax.random.PRNGKey(0)
    kx, k1, k2, k3, k4 = jax.random.split(key, 5)

    x = jax.random.normal(kx, (batch, input_dim), dtype=jnp.float32)
    bound1 = 1.0 / (input_dim ** 0.5)
    bound2 = 1.0 / (hidden_dim ** 0.5)
    w1 = jax.random.uniform(k1, (input_dim, hidden_dim), jnp.float32, -bound1, bound1)
    b1 = jax.random.uniform(k2, (hidden_dim,), jnp.float32, -bound1, bound1)
    w2 = jax.random.uniform(k3, (hidden_dim, output_dim), jnp.float32, -bound2, bound2)
    b2 = jax.random.uniform(k4, (output_dim,), jnp.float32, -bound2, bound2)

    out = jax.block_until_ready(two_layer_forward(x, w1, b1, w2, b2))
    ref = reference_forward(x, w1, b1, w2, b2)

    assert out.shape == (batch, output_dim)
    # bf16 MXU inputs with f32 accumulation: compare against f32 reference with a
    # tolerance comfortably above bf16 rounding at these magnitudes.
    assert jnp.allclose(out, ref, atol=2e-2, rtol=2e-2), "mismatch vs reference"

    print("KERNEL_OK")
</pallas_src>

<mosaic_0001>
module attributes {stable_mosaic.version = 11 : i64} {
  func.func @two_layer_kernel(%arg0: i32, %arg1: memref<128x128xbf16, #tpu.memory_space<vmem>>, %arg2: memref<128x128xbf16, #tpu.memory_space<vmem>>, %arg3: memref<1x128xf32, #tpu.memory_space<vmem>>, %arg4: memref<128x128xbf16, #tpu.memory_space<vmem>>, %arg5: memref<1x128xf32, #tpu.memory_space<vmem>>, %arg6: memref<128x128xf32, #tpu.memory_space<vmem>>) attributes {dimension_semantics = [#tpu.dimension_semantics<parallel>], iteration_bounds = array<i64: 2>, scalar_prefetch = 0 : i64, scratch_operands = 0 : i64, tpu.core_type = #tpu.core_type<tc>, window_params = [{transform_indices = @transform_0, window_bounds = array<i64: 128, 128>}, {pipeline_mode = #tpu.pipeline_mode<synchronous>, transform_indices = @transform_1, window_bounds = array<i64: 128, 128>}, {pipeline_mode = #tpu.pipeline_mode<synchronous>, transform_indices = @transform_2, window_bounds = array<i64: 1, 128>}, {pipeline_mode = #tpu.pipeline_mode<synchronous>, transform_indices = @transform_3, window_bounds = array<i64: 128, 128>}, {pipeline_mode = #tpu.pipeline_mode<synchronous>, transform_indices = @transform_4, window_bounds = array<i64: 1, 128>}, {transform_indices = @transform_5, window_bounds = array<i64: 128, 128>}]} {
    %c0 = arith.constant 0 : index
    %c0_0 = arith.constant 0 : index
    %0 = vector.load %arg1[%c0, %c0_0] : memref<128x128xbf16, #tpu.memory_space<vmem>>, vector<128x128xbf16>
    %c0_1 = arith.constant 0 : index
    %c0_2 = arith.constant 0 : index
    %1 = vector.load %arg2[%c0_1, %c0_2] : memref<128x128xbf16, #tpu.memory_space<vmem>>, vector<128x128xbf16>
    %cst = arith.constant dense<0.000000e+00> : vector<128x128xf32>
    %2 = tpu.matmul %0, %1, %cst {dimension_numbers = #tpu.dot_dimension_numbers<[1], [0], [0], [1], [0, 0, 1, 1], [], []>} : vector<128x128xbf16>, vector<128x128xbf16>, vector<128x128xf32> -> vector<128x128xf32>
    %c0_3 = arith.constant 0 : index
    %c0_4 = arith.constant 0 : index
    %3 = vector.load %arg3[%c0_3, %c0_4] : memref<1x128xf32, #tpu.memory_space<vmem>>, vector<1x128xf32>
    %4 = vector.broadcast %3 : vector<1x128xf32> to vector<128x128xf32>
    %5 = arith.addf %2, %4 : vector<128x128xf32>
    %cst_5 = arith.constant 0.000000e+00 : f32
    %6 = vector.broadcast %cst_5 : f32 to vector<128x128xf32>
    %7 = arith.maximumf %5, %6 : vector<128x128xf32>
    %8 = arith.truncf %7 : vector<128x128xf32> to vector<128x128xbf16>
    %c0_6 = arith.constant 0 : index
    %c0_7 = arith.constant 0 : index
    %9 = vector.load %arg4[%c0_6, %c0_7] : memref<128x128xbf16, #tpu.memory_space<vmem>>, vector<128x128xbf16>
    %cst_8 = arith.constant dense<0.000000e+00> : vector<128x128xf32>
    %10 = tpu.matmul %8, %9, %cst_8 {dimension_numbers = #tpu.dot_dimension_numbers<[1], [0], [0], [1], [0, 0, 1, 1], [], []>} : vector<128x128xbf16>, vector<128x128xbf16>, vector<128x128xf32> -> vector<128x128xf32>
    %c0_9 = arith.constant 0 : index
    %c0_10 = arith.constant 0 : index
    %11 = vector.load %arg5[%c0_9, %c0_10] : memref<1x128xf32, #tpu.memory_space<vmem>>, vector<1x128xf32>
    %12 = vector.broadcast %11 : vector<1x128xf32> to vector<128x128xf32>
    %13 = arith.addf %10, %12 : vector<128x128xf32>
    %14 = arith.negf %13 : vector<128x128xf32>
    %15 = math.exp %14 : vector<128x128xf32>
    %cst_11 = arith.constant 1.000000e+00 : f32
    %16 = vector.broadcast %cst_11 : f32 to vector<128x128xf32>
    %17 = arith.addf %16, %15 : vector<128x128xf32>
    %18 = arith.divf %16, %17 : vector<128x128xf32>
    %c0_12 = arith.constant 0 : index
    %c0_13 = arith.constant 0 : index
    %19 = vector.load %arg6[%c0_12, %c0_13] : memref<128x128xf32, #tpu.memory_space<vmem>>, vector<128x128xf32>
    tpu.vector_store %arg6[%c0_12, %c0_13], %18 {strides = array<i32>} : memref<128x128xf32, #tpu.memory_space<vmem>>, vector<128x128xf32>,
    return
  }
  func.func @transform_0(%arg0: i32) -> (i32, i32) {
    %c0_i32 = arith.constant 0 : i32
    %c0_i32_0 = arith.constant 0 : i32
    return %arg0, %c0_i32 : i32, i32
  }
  func.func @transform_1(%arg0: i32) -> (i32, i32) {
    %c0_i32 = arith.constant 0 : i32
    %c0_i32_0 = arith.constant 0 : i32
    %c0_i32_1 = arith.constant 0 : i32
    return %c0_i32, %c0_i32_0 : i32, i32
  }
  func.func @transform_2(%arg0: i32) -> (i32, i32) {
    %c0_i32 = arith.constant 0 : i32
    %c0_i32_0 = arith.constant 0 : i32
    %c0_i32_1 = arith.constant 0 : i32
    return %c0_i32, %c0_i32_0 : i32, i32
  }
  func.func @transform_3(%arg0: i32) -> (i32, i32) {
    %c0_i32 = arith.constant 0 : i32
    %c0_i32_0 = arith.constant 0 : i32
    %c0_i32_1 = arith.constant 0 : i32
    return %c0_i32, %c0_i32_0 : i32, i32
  }
  func.func @transform_4(%arg0: i32) -> (i32, i32) {
    %c0_i32 = arith.constant 0 : i32
    %c0_i32_0 = arith.constant 0 : i32
    %c0_i32_1 = arith.constant 0 : i32
    return %c0_i32, %c0_i32_0 : i32, i32
  }
  func.func @transform_5(%arg0: i32) -> (i32, i32) {
    %c0_i32 = arith.constant 0 : i32
    %c0_i32_0 = arith.constant 0 : i32
    return %arg0, %c0_i32 : i32, i32
  }
}

</mosaic_0001>

<bundles_post_ra>
// kernel: tpu_custom_call.1
= control target key start
LH: loop header
LB: loop body
LE: loop exit
PB: predicated region body
PF: predicated region fallthrough
CT: control target
= control target key end

     0   :  { %10 = vsyncpa [#allocation3], 0  ;;  %s1727_s0 = inlined_call_operand.hbm [shape: bf16[256,128], index: 0, kind: input, shape index: {}]   ;;  %s1728_s1 = inlined_call_operand.hbm [shape: bf16[128,128], index: 1, kind: input, shape index: {}]   ;;  %s1729_s2 = inlined_call_operand.vmem [shape: f32[1,128], index: 2, kind: input, shape index: {}]   ;;  %s1730_s3 = inlined_call_operand.hbm [shape: bf16[128,128], index: 3, kind: input, shape index: {}]   ;;  %s1731_s4 = inlined_call_operand.vmem [shape: f32[1,128], index: 4, kind: input, shape index: {}]   ;;  %s1732_s5 = inlined_call_operand.hbm [shape: f32[256,128], index: 5, kind: output, shape index: {}]  }
   0x1   :  { %12 = vsyncpa [#allocation3 + $0x1], 0 }
   0x2   :  { %13 = vsyncpa [#allocation6], 0 }
   0x3   :  { %14 = vsyncpa [#allocation4], 0 }
   0x4   :  { %16 = vsyncpa [#allocation4 + $0x1], 0  ;;  %s1430_s18 = smov 0   ;;  %s1432_s19 = smov 0  }
   0x5   :  { %s1434_s20 = smov 0   ;;  %s1436_s21 = smov 0  }
   0x6 LB: > { %s1451_s22 = sadd.s32 4294967295, %s1390_s21   ;;  %s917_s23 = sadd.s32 4294967294, %s1390_s21   ;;  %s1390_s21 = sphi %s1436_s21, %s1752_s21   ;;  %s1386_s20 = sphi %s1434_s20, %s1751_s20   ;;  %s1382_s19 = sphi %s1432_s19, %s1750_s19   ;;  %s1378_s18 = sphi %s1430_s18, %s1749_s18  }
   0x7   : > { %p42_p0 = scmp.ne.s32.totalorder %s1382_s19, %s1378_s18  ;;  %p1733_p1 = scmp.eq.s32.totalorder %s1451_s22, 0 }
   0x8   : > { %p156_p3 = scmp.eq.s32.totalorder %s917_s23, 1  ;;  %p918_p5 = scmp.ge.s32.totalorder %s1390_s21, 1 }
   0x9   : > { %p1460_p4 = por %p1733_p1, %p42_p0  ;;  %p163_p7 = scmp.lt.s32.totalorder %s1390_s21, 3 }
   0xa   : > { %p1465_p6 = por %p156_p3, %p42_p0  ;;  %s1392_s27 = smov [#allocation5]  }
   0xb   : > { %s1736_s24 = scalar_select %p1460_p4, 1, 0 }
   0xc   : > { %s1737_s25 = scalar_select %p1465_p6, 1, 0 }
   0xd   : > { %p1470_p8 = pnand %p918_p5, %p163_p7  ;;  %s175_s28 = sshll.u32 %s1392_s27, 4  ;;  %s1474_s28 = int_to_ptr.vmem [resolvable:$true] %s175_s28 }
   0xe   : > { %s1393_s30 = smov [#allocation7]   ;;  %s1234_s9 = scalar_lea.hbm %s1728_s1, 1024 }
   0xf   : > { %p1087_p9 = pneg %p1470_p8  ;;  %s191_s6 = sshll.u32 %s1393_s30, 4  ;;  %s1485_s6 = int_to_ptr.vmem [resolvable:$true] %s191_s6 }
  0x10   : > { %p1235_p12 = scmp.ne.s32.totalorder %s1728_s1, %s1234_s9  ;;  %p1241_p5 = scmp.lt.u32.totalorder %s1234_s9, %s1728_s1 }
  0x11   : > { %p1481_p11 = pnand %p1087_p9, %p1733_p1 }
  0x13   : > { %p1236_p13 = pneg %p1481_p11 }
  0x15   : > { %p1237_p0 = pnand %p1236_p13, %p1235_p12 }
  0x17   : > { %p1238_p3 = pneg %p1237_p0 }
  0x19   : > { %p1243_p7 = pnand %p1241_p5, %p1238_p3 }
  0x1b   : > { %1246 = shalt.err (!%p1243_p7)
}
  0x1c   : > { %s1247_s14 = scalar_lea.vmem %s1474_s28, 1024  ;;  %p1255_p2 = scmp.lt.s32.totalorder %s1474_s28, %s1474_s28 }
  0x1d   : > { %p1248_p9 = scmp.ne.s32.totalorder %s1474_s28, %s1247_s14  ;;  %p1256_p12 = scmp.lt.s32.totalorder %s1247_s14, %s1247_s14 }
  0x1f   : > { %p1250_p10 = pnand %p1248_p9, %p1236_p13  ;;  %p1257_p0 = por %p1256_p12, %p1255_p2 }
  0x21   : > { %p1251_p1 = pneg %p1250_p10 }
  0x23   : > { %p1258_p6 = pnand %p1257_p0, %p1251_p1 }
  0x25   : > { %1261 = shalt.err (!%p1258_p6)
}
  0x26   : > { %s1394_s15 = smov 64   ;;  %s1395_s16 = smov 4  }
  0x27   : > { %1090 = dma.hbm_to_vmem [thread:$0]  (!%p1481_p11), %s1728_s1, 1024, %s1474_s28, [#allocation6], %s1394_s15, %s1394_s15, %s1395_s16  }
  0x28   : > { %s1262_s7 = scalar_lea.hbm %s1730_s3, 1024 }
  0x29   : > { %p1263_p1 = scmp.ne.s32.totalorder %s1730_s3, %s1262_s7  ;;  %p1269_p10 = scmp.lt.u32.totalorder %s1262_s7, %s1730_s3 }
  0x2b   : > { %p1265_p2 = pnand %p1263_p1, %p1236_p13 }
  0x2d   : > { %p1266_p6 = pneg %p1265_p2 }
  0x2f   : > { %p1271_p3 = pnand %p1269_p10, %p1266_p6 }
  0x31   : > { %1274 = shalt.err (!%p1271_p3)
}
  0x32   : > { %s1275_s28 = scalar_lea.vmem %s1485_s6, 1024  ;;  %p1283_p12 = scmp.lt.s32.totalorder %s1485_s6, %s1485_s6 }
  0x33   : > { %p1276_p5 = scmp.ne.s32.totalorder %s1485_s6, %s1275_s28  ;;  %p1284_p0 = scmp.lt.s32.totalorder %s1275_s28, %s1275_s28 }
  0x35   : > { %p1278_p7 = pnand %p1276_p5, %p1236_p13  ;;  %p1285_p1 = por %p1284_p0, %p1283_p12 }
  0x37   : > { %p1279_p9 = pneg %p1278_p7 }
  0x39   : > { %p1286_p2 = pnand %p1285_p1, %p1279_p9 }
  0x3b   : > { %1289 = shalt.err (!%p1286_p2)
}
  0x3c   : > { %1093 = dma.hbm_to_vmem [thread:$0]  (!%p1481_p11), %s1730_s3, 1024, %s1485_s6, [#allocation6], %s1394_s15, %s1394_s15, %s1395_s16  }
  0x3d   : > { %s1546_s29 = sadd.s32 1, %s1390_s21   ;;  %s29_s14 = sadd.s32 1, %s1386_s20 }
  0x3e   : > { %s26_s17 = ssub.s32 %s1390_s21, %s1546_s29  ;;  %p36_p13 = scmp.ne.s32.totalorder %s1386_s20, %s1382_s19 }
  0x3f   : > { %p27_p6 = scmp.eq.s32.totalorder %s26_s17, 0  ;;  %p37_p10 = scmp.eq.s32.totalorder %s1390_s21, 0 }
  0x40   : > { %p1740_p3 = scmp.eq.s32.totalorder %s1451_s22, 1  ;;  %p1104_p7 = scmp.lt.s32.totalorder %s1390_s21, 2 }
  0x41   : > { %s1562_s27 = scalar_select %p27_p6, %s1386_s20, %s29_s14  }
  0x42   : > { %p1556_p5 = por %p1740_p3, %p36_p13  ;;  %p38_p9 = por %p37_p10, %p36_p13 }
  0x43   : > { %s208_s30 = sand.u32 1, %s1386_s20   ;;  %s977_s6 = sshll.u32 %s1390_s21, 10 }
  0x44   : > { %s1741_s23 = scalar_select %p1556_p5, 1, 0 }
  0x45   : > { %s922_s7 = sshll.u32 %s208_s30, 6  ;;  %s1569_s10 = scalar_lea.hbm %s1727_s0, %s977_s6 }
  0x46   : > { %s212_s11 = scalar_lea.vmem [#allocation2], %s922_s7  ;;  %p1573_p11 = pnand %p1104_p7, %p38_p9 }
  0x47   : > { %s219_s28 = sshll.u32 %s212_s11, 4  ;;  %s1577_s13 = scalar_lea.sflag [#allocation3], %s208_s30  ;;  %s1571_s28 = int_to_ptr.vmem [resolvable:$true] %s219_s28 }
  0x48   : > { %s1290_s14 = scalar_lea.hbm %s1569_s10, 1024  ;;  %p1292_p0 = pneg %p1573_p11 }
  0x49   : > { %p1291_p12 = scmp.ne.s32.totalorder %s1569_s10, %s1290_s14  ;;  %s1295_s6 = scalar_lea.hbm %s1727_s0, 2048 }
  0x4a   : > { %p1296_p13 = scmp.lt.u32.totalorder %s1569_s10, %s1727_s0  ;;  %p1297_p6 = scmp.lt.u32.totalorder %s1295_s6, %s1290_s14 }
  0x4b   : > { %p1293_p1 = pnand %p1292_p0, %p1291_p12  ;;  %p1299_p3 = scmp.lt.u32.totalorder %s1290_s14, %s1569_s10 }
  0x4c   : > { %p1298_p10 = por %p1297_p6, %p1296_p13 }
  0x4d   : > { %p1294_p2 = pneg %p1293_p1 }
  0x4e   : > { %p1300_p7 = por %p1299_p3, %p1298_p10 }
  0x50   : > { %p1301_p9 = pnand %p1300_p7, %p1294_p2 }
  0x52   : > { %1304 = shalt.err (!%p1301_p9)
}
  0x53   : > { %s1305_s30 = scalar_lea.vmem %s1571_s28, 1024  ;;  %s1396_s11 = smov [#allocation2]  }
  0x54   : > { %p1306_p12 = scmp.ne.s32.totalorder %s1571_s28, %s1305_s30  ;;  %s1310_s17 = sshll.u32 %s1396_s11, 4  ;;  %s1311_s17 = int_to_ptr.vmem [resolvable:$false] %s1310_s17 }
  0x55   : > { %s1312_s7 = scalar_lea.vmem %s1311_s17, 2048  ;;  %p1313_p4 = scmp.lt.s32.totalorder %s1571_s28, %s1311_s17 }
  0x56   : > { %p1308_p1 = pnand %p1306_p12, %p1292_p0  ;;  %p1314_p13 = scmp.lt.s32.totalorder %s1312_s7, %s1305_s30 }
  0x58   : > { %p1309_p5 = pneg %p1308_p1  ;;  %p1315_p6 = por %p1314_p13, %p1313_p4 }
  0x5a   : > { %p1316_p10 = pnand %p1315_p6, %p1309_p5 }
  0x5c   : > { %1319 = shalt.err (!%p1316_p10)
}
  0x5d   : > { %1097 = dma.hbm_to_vmem [thread:$0]  (!%p1573_p11), %s1569_s10, 1024, %s1571_s28, %s1577_s13, %s1394_s15, %s1394_s15, %s1395_s16  }
  0x5e   : > { %231 = sbr.rel (%p1470_p8) target bundleno = 643 (0x283), region = 40  ;;  %s1611_s14 = sand.u32 (!%p1470_p8), 1, %s1382_s19  }
  0x5f   : > { %s926_s6 = sshll.u32 (!%p1470_p8), %s1611_s14, 6  ;;  %s234_s8 = scalar_lea.sflag (!%p1470_p8), [#allocation3], %s1611_s14 }
  0x60   : > { %s1615_s9 = scalar_lea.vmem (!%p1470_p8), [#allocation2], %s926_s6  ;;  %p1743_p4 = scmp.ne.s32.totalorder (!%p1470_p8), %s1736_s24, 0 }
  0x65   : > { %1365 = dma.done.wait (%p1743_p4), %s234_s8, 1024  }
  0x66   : > { %1367 = vsyncadd (%p1743_p4), %s234_s8, 4294966272  ;;  %p1744_p5 = scmp.eq.s32.totalorder %s1451_s22, 0 }
  0x68   : > { %1369 = dma.done.wait (%p1744_p5), [#allocation6], 2048   ;;  %p1745_p8 = pmov %p1744_p5 }
  0x69   : > { %v1146_v0 = vld [vmem:[#allocation5] sm:$0xff]   ;;  %v1147_v1 = vld [vmem:[#allocation5 + $0x8] sm:$0xff]   ;;  %v1148_v2 = vld [vmem:[#allocation5 + $0x10] sm:$0xff]   ;;  %s929_s10 = sshll.u32 %s1611_s14, 7  ;;  %s978_s12 = sshll.u32 %s1451_s22, 11 }
  0x6a   : > { %1371 = vsyncadd (%p1745_p8), [#allocation6], 4294965248  ;;  %1011 = vmatprep.subr.bf16.mxu0 %v1146_v0  ;;  %v1149_v3 = vld [vmem:[#allocation5 + $0x18] sm:$0xff]   ;;  %v1154_v4 = vld [vmem:[%s1615_s9] sm:$0xff]   ;;  %s1658_s28 = scalar_lea.vmem [#allocation8], %s929_s10  ;;  %s1678_s17 = scalar_lea.hbm %s1732_s5, %s978_s12 }
  0x6b   : > { %1012 = vmatpush3.bf16.msra.mxu0 %v1146_v0  ;;  %1027 = vmatprep.mubr.bf16.mxu0 %v1154_v4  ;;  %v1150_v5 = vld [vmem:[#allocation5 + $0x20] sm:$0xff]   ;;  %v1151_v6 = vld [vmem:[#allocation5 + $0x28] sm:$0xff]   ;;  %v1152_v9 = vld [vmem:[#allocation5 + $0x30] sm:$0xff]   ;;  %s825_s13 = sshll.u32 %s1658_s28, 4  ;;  %s812_s22 = scalar_lea.sflag [#allocation4], %s1611_s14  ;;  %s1680_s13 = int_to_ptr.vmem [resolvable:$true] %s825_s13 }
  0x6c   : > { %1013 = vmatprep.subr.bf16.mxu0 %v1147_v1  ;;  %v1162_v7 = vld [vmem:[#allocation7] sm:$0xff]   ;;  %v1163_v8 = vld [vmem:[#allocation7 + $0x8] sm:$0xff]   ;;  %v1164_v10 = vld [vmem:[#allocation7 + $0x10] sm:$0xff]   ;;  %s1320_s7 = scalar_lea.vmem %s1680_s13, 2048  ;;  %p1746_p0 = scmp.ne.s32.totalorder %s1741_s23, 0 }
  0x6d   : > { %1043 = vmatprep.subr.bf16.mxu1 %v1162_v7  ;;  %v1153_v11 = vld [vmem:[#allocation5 + $0x38] sm:$0xff]   ;;  %v1166_v13 = vld [vmem:[#allocation7 + $0x20] sm:$0xff]   ;;  %v1155_v14 = vld [vmem:[%s1615_s9 + $0x8] sm:$0xff]   ;;  %p1321_p11 = scmp.ne.s32.totalorder %s1680_s13, %s1320_s7  ;;  %s1397_s6 = smov [#allocation8]  }
  0x6e   : > { %1044 = vmatpush3.bf16.msra.mxu1 %v1162_v7  ;;  %v1165_v12 = vld [vmem:[#allocation7 + $0x18] sm:$0xff]   ;;  %v1156_v15 = vld [vmem:[%s1615_s9 + $0x10] sm:$0xff]   ;;  %v1167_v16 = vld [vmem:[#allocation7 + $0x28] sm:$0xff]   ;;  %s1324_s8 = sshll.u32 %s1397_s6, 4  ;;  %s1325_s8 = int_to_ptr.vmem [resolvable:$false] %s1324_s8 }
  0x6f   : > { %1014 = vmatpush3.bf16.msra.mxu0 %v1147_v1  ;;  %1045 = vmatprep.subr.bf16.mxu1 %v1163_v8  ;;  %v1157_v17 = vld [vmem:[%s1615_s9 + $0x18] sm:$0xff]   ;;  %v1158_v18 = vld [vmem:[%s1615_s9 + $0x20] sm:$0xff]   ;;  %v1159_v19 = vld [vmem:[%s1615_s9 + $0x28] sm:$0xff]   ;;  %p1322_p2 = pnand %p1321_p11, %p1746_p0  ;;  %p1327_p7 = scmp.lt.s32.totalorder %s1680_s13, %s1325_s8 }
  0x70   : > { %1015 = vmatprep.subr.bf16.mxu0 %v1148_v2  ;;  %v1160_v20 = vld [vmem:[%s1615_s9 + $0x30] sm:$0xff]   ;;  %v1161_v21 = vld [vmem:[%s1615_s9 + $0x38] sm:$0xff]   ;;  %v930_v24 = vld [vmem:[%s1729_s2] ss:$0 sm:$0xff]  ;;  %s1326_s9 = scalar_lea.vmem %s1325_s8, 4096 }
  0x71   : > { %v1168_v22 = vld [vmem:[#allocation7 + $0x30] sm:$0xff]   ;;  %v1169_v23 = vld [vmem:[#allocation7 + $0x38] sm:$0xff]   ;;  %p1323_p3 = pneg %p1322_p2  ;;  %p1328_p9 = scmp.lt.s32.totalorder %s1326_s9, %s1320_s7 }
  0x72   : > { %1046 = vmatpush3.bf16.msra.mxu1 %v1163_v8 }
  0x73   : > { %1016 = vmatpush3.bf16.msra.mxu0 %v1148_v2  ;;  %1047 = vmatprep.subr.bf16.mxu1 %v1164_v10  ;;  %p1329_p12 = por %p1328_p9, %p1327_p7 }
  0x74   : > { %1017 = vmatprep.subr.bf16.mxu0 %v1149_v3 }
  0x75   : > { %p1330_p1 = pnand %p1329_p12, %p1323_p3 }
  0x76   : > { %1048 = vmatpush3.bf16.msra.mxu1 %v1164_v10 }
  0x77   : > { %1018 = vmatpush3.bf16.msra.mxu0 %v1149_v3  ;;  %1049 = vmatprep.subr.bf16.mxu1 %v1165_v12 }
  0x78   : > { %1019 = vmatprep.subr.bf16.mxu0 %v1150_v5 }
  0x7a   : > { %1050 = vmatpush3.bf16.msra.mxu1 %v1165_v12 }
  0x7b   : > { %1020 = vmatpush3.bf16.msra.mxu0 %v1150_v5  ;;  %1051 = vmatprep.subr.bf16.mxu1 %v1166_v13 }
  0x7c   : > { %1021 = vmatprep.subr.bf16.mxu0 %v1151_v6 }
  0x7e   : > { %1052 = vmatpush3.bf16.msra.mxu1 %v1166_v13 }
  0x7f   : > { %1022 = vmatpush3.bf16.msra.mxu0 %v1151_v6  ;;  %1053 = vmatprep.subr.bf16.mxu1 %v1167_v16 }
  0x80   : > { %1023 = vmatprep.subr.bf16.mxu0 %v1152_v9 }
  0x82   : > { %1054 = vmatpush3.bf16.msra.mxu1 %v1167_v16 }
  0x83   : > { %1024 = vmatpush3.bf16.msra.mxu0 %v1152_v9  ;;  %1055 = vmatprep.subr.bf16.mxu1 %v1168_v22 }
  0x84   : > { %1025 = vmatprep.subr.bf16.mxu0 %v1153_v11 }
  0x86   : > { %1056 = vmatpush3.bf16.msra.mxu1 %v1168_v22 }
  0x87   : > { %1026 = vmatpush3.bf16.msra.mxu0 %v1153_v11  ;;  %1057 = vmatprep.subr.bf16.mxu1 %v1169_v23 }
  0x8a   : > { %1028 = vmatmul.mubr.bf16.vlgmr.msra.gmra.mrb[0].mxu0 %v1155_v14  ;;  %1058 = vmatpush3.bf16.msra.mxu1 %v1169_v23 }
  0x8b   : > { %1031 = vmatprep.mubr.bf16.mxu0 %v1156_v15 }
  0x92   : > { %1032 = vmatmul.mubr.bf16.gmra.mrb[4].mxu0 %v1157_v17  ;;  %v1639_v17 = vld [vmem:[%s1731_s4] ss:$0 sm:$0xff] }
  0x93   : > { %1035 = vmatprep.mubr.bf16.mxu0 %v1158_v18 }
  0x9a   : > { %1036 = vmatmul.mubr.bf16.gmra.mrb[8].mxu0 %v1159_v19 }
  0x9b   : > { %1039 = vmatprep.mubr.bf16.mxu0 %v1160_v20 }
  0xa2   : > { %1040 = vmatmul.mubr.bf16.gmra.mrb[12].mxu0 %v1161_v21 }
 0x15d   : > { %v1029_v25 = vpop.f32.mrb[0].mxu0 }
 0x15e   : > { %v453_v26 = vadd.f32 %v1029_v25, %v930_v24  ;;  %v444_v27 = vpop.f32.mrb[1].mxu0 }
 0x15f   : > { %v445_v28 = vadd.f32 %v930_v24, %v444_v27  ;;  %v1030_v29 = vpop.f32.mrb[2].mxu0 }
 0x160   : > { %v456_v30 = vadd.f32 %v1030_v29, %v930_v24  ;;  %v447_v31 = vpop.f32.mrb[3].mxu0  ;;  %v509_v33 = vmax.f32 %v453_v26, 0.0 }
 0x161   : > { %v448_v32 = vadd.f32 %v930_v24, %v447_v31  ;;  %v507_v35 = vmax.f32 %v445_v28, 0.0 }
 0x162   : > { %v510_v34 = vmax.f32 %v456_v30, 0.0 }
 0x163   : > { %v508_v36 = vmax.f32 %v448_v32, 0.0 }
 0x164   : > { %v524_v37 = vpack.c.bf16 %v510_v34, %v509_v33 }
 0x165   : > { %v1033_v38 = vpop.f32.mrb[4].mxu0  ;;  %v523_v39 = vpack.c.bf16 %v508_v36, %v507_v35 }
 0x166   : > { %v469_v40 = vadd.f32 %v1033_v38, %v930_v24  ;;  %v460_v41 = vpop.f32.mrb[5].mxu0 }
 0x167   : > { %v461_v42 = vadd.f32 %v930_v24, %v460_v41  ;;  %v1034_v43 = vpop.f32.mrb[6].mxu0  ;;  %1059 = vmatprep.mubr.bf16.mxu1 %v523_v39 }
 0x168   : > { %v472_v44 = vadd.f32 %v1034_v43, %v930_v24  ;;  %v463_v45 = vpop.f32.mrb[7].mxu0  ;;  %1060 = vmatmul.mubr.bf16.vlgmr.msra.gmra.mrb[0].mxu1 %v524_v37  ;;  %v513_v47 = vmax.f32 %v469_v40, 0.0 }
 0x169   : > { %v464_v46 = vadd.f32 %v930_v24, %v463_v45  ;;  %v511_v49 = vmax.f32 %v461_v42, 0.0 }
 0x16a   : > { %v514_v48 = vmax.f32 %v472_v44, 0.0 }
 0x16b   : > { %v512_v50 = vmax.f32 %v464_v46, 0.0 }
 0x16c   : > { %v526_v51 = vpack.c.bf16 %v514_v48, %v513_v47 }
 0x16d   : > { %v525_v52 = vpack.c.bf16 %v512_v50, %v511_v49  ;;  %v1037_v53 = vpop.f32.mrb[8].mxu0 }
 0x16e   : > { %v485_v54 = vadd.f32 %v1037_v53, %v930_v24  ;;  %v476_v55 = vpop.f32.mrb[9].mxu0 }
 0x16f   : > { %v477_v56 = vadd.f32 %v930_v24, %v476_v55  ;;  %v1038_v57 = vpop.f32.mrb[10].mxu0  ;;  %1063 = vmatprep.mubr.bf16.mxu1 %v525_v52 }
 0x170   : > { %v488_v58 = vadd.f32 %v1038_v57, %v930_v24  ;;  %v479_v59 = vpop.f32.mrb[11].mxu0  ;;  %1064 = vmatmul.mubr.bf16.gmra.mrb[4].mxu1 %v526_v51  ;;  %v517_v61 = vmax.f32 %v485_v54, 0.0 }
 0x171   : > { %v480_v60 = vadd.f32 %v930_v24, %v479_v59  ;;  %v515_v63 = vmax.f32 %v477_v56, 0.0 }
 0x172   : > { %v518_v62 = vmax.f32 %v488_v58, 0.0 }
 0x173   : > { %v516_v0 = vmax.f32 %v480_v60, 0.0 }
 0x174   : > { %v528_v1 = vpack.c.bf16 %v518_v62, %v517_v61 }
 0x175   : > { %v527_v2 = vpack.c.bf16 %v516_v0, %v515_v63  ;;  %v1041_v3 = vpop.f32.mrb[12].mxu0 }
 0x176   : > { %v501_v4 = vadd.f32 %v1041_v3, %v930_v24  ;;  %v492_v5 = vpop.f32.mrb[13].mxu0 }
 0x177   : > { %v493_v6 = vadd.f32 %v930_v24, %v492_v5  ;;  %v1042_v7 = vpop.f32.mrb[14].mxu0  ;;  %1067 = vmatprep.mubr.bf16.mxu1 %v527_v2 }
 0x178   : > { %v504_v8 = vadd.f32 %v1042_v7, %v930_v24  ;;  %v495_v9 = vpop.f32.mrb[15].mxu0  ;;  %1068 = vmatmul.mubr.bf16.gmra.mrb[8].mxu1 %v528_v1  ;;  %v521_v11 = vmax.f32 %v501_v4, 0.0 }
 0x179   : > { %v496_v10 = vadd.f32 %v930_v24, %v495_v9  ;;  %v519_v13 = vmax.f32 %v493_v6, 0.0 }
 0x17a   : > { %v522_v12 = vmax.f32 %v504_v8, 0.0 }
 0x17b   : > { %v520_v14 = vmax.f32 %v496_v10, 0.0 }
 0x17c   : > { %v530_v15 = vpack.c.bf16 %v522_v12, %v521_v11 }
 0x17d   : > { %v529_v16 = vpack.c.bf16 %v520_v14, %v519_v13 }
 0x17f   : > { %1071 = vmatprep.mubr.bf16.mxu1 %v529_v16 }
 0x180   : > { %1072 = vmatmul.mubr.bf16.gmra.mrb[12].mxu1 %v530_v15 }
 0x23b   : > { %v1061_v18 = vpop.f32.mrb[0].mxu1 }
 0x23c   : > { %v645_v19 = vadd.f32 %v1061_v18, %v1639_v17  ;;  %v636_v20 = vpop.f32.mrb[1].mxu1 }
 0x23d   : > { %v637_v21 = vadd.f32 %v1639_v17, %v636_v20  ;;  %v1062_v22 = vpop.f32.mrb[2].mxu1 }
 0x23e   : > { %v958_v23 = vmul.f32 -1.442695, %v645_v19  ;;  %v648_v24 = vadd.f32 %v1062_v22, %v1639_v17  ;;  %v639_v25 = vpop.f32.mrb[3].mxu1 }
 0x23f   : > { %v956_v26 = vmul.f32 -1.442695, %v637_v21  ;;  %v640_v27 = vadd.f32 %v1639_v17, %v639_v25 }
 0x240   : > { %1170 = vpow2.f32 %v958_v23  ;;  %v959_v28 = vmul.f32 -1.442695, %v648_v24 }
 0x241   : > { %1172 = vpow2.f32 %v956_v26  ;;  %v957_v29 = vmul.f32 -1.442695, %v640_v27 }
 0x242   : > { %1174 = vpow2.f32 %v959_v28 }
 0x243   : > { %1176 = vpow2.f32 %v957_v29  ;;  %v1065_v30 = vpop.f32.mrb[4].mxu1 }
 0x244   : > { %v661_v31 = vadd.f32 %v1065_v30, %v1639_v17  ;;  %v652_v32 = vpop.f32.mrb[5].mxu1 }
 0x245   : > { %v653_v33 = vadd.f32 %v1639_v17, %v652_v32  ;;  %v1066_v34 = vpop.f32.mrb[6].mxu1 }
 0x246   : > { %v962_v35 = vmul.f32 -1.442695, %v661_v31  ;;  %v664_v36 = vadd.f32 %v1066_v34, %v1639_v17  ;;  %v655_v37 = vpop.f32.mrb[7].mxu1 }
 0x247   : > { %v960_v38 = vmul.f32 -1.442695, %v653_v33  ;;  %v656_v39 = vadd.f32 %v1639_v17, %v655_v37 }
 0x248   : > { %1178 = vpow2.f32 %v962_v35  ;;  %v963_v40 = vmul.f32 -1.442695, %v664_v36 }
 0x249   : > { %1180 = vpow2.f32 %v960_v38  ;;  %v961_v41 = vmul.f32 -1.442695, %v656_v39 }
 0x24a   : > { %v1171_v42 = vpop.eup %1170  ;;  %1182 = vpow2.f32 %v963_v40 }
 0x24b   : > { %v1173_v43 = vpop.eup %1172  ;;  %v749_v44 = vadd.f32 1.0, %v1171_v42  ;;  %1184 = vpow2.f32 %v961_v41  ;;  %v1069_v45 = vpop.f32.mrb[8].mxu1 }
 0x24c   : > { %v1175_v46 = vpop.eup %1174  ;;  %v747_v47 = vadd.f32 1.0, %v1173_v43  ;;  %v677_v48 = vadd.f32 %v1069_v45, %v1639_v17  ;;  %v668_v49 = vpop.f32.mrb[9].mxu1 }
 0x24d   : > { %v1177_v50 = vpop.eup %1176  ;;  %1186 = vrcp.f32 %v749_v44  ;;  %v750_v51 = vadd.f32 1.0, %v1175_v46  ;;  %v669_v52 = vadd.f32 %v1639_v17, %v668_v49  ;;  %v1070_v53 = vpop.f32.mrb[10].mxu1 }
 0x24e   : > { %1188 = vrcp.f32 %v747_v47  ;;  %v748_v54 = vadd.f32 1.0, %v1177_v50  ;;  %v966_v55 = vmul.f32 -1.442695, %v677_v48  ;;  %v680_v56 = vadd.f32 %v1070_v53, %v1639_v17  ;;  %v671_v57 = vpop.f32.mrb[11].mxu1 }
 0x24f   : > { %1190 = vrcp.f32 %v750_v51  ;;  %v964_v58 = vmul.f32 -1.442695, %v669_v52  ;;  %v672_v59 = vadd.f32 %v1639_v17, %v671_v57 }
 0x250   : > { %1192 = vrcp.f32 %v748_v54  ;;  %v967_v60 = vmul.f32 -1.442695, %v680_v56 }
 0x251   : > { %1194 = vpow2.f32 %v966_v55  ;;  %v965_v61 = vmul.f32 -1.442695, %v672_v59 }
 0x252   : > { %v1179_v62 = vpop.eup %1178  ;;  %1196 = vpow2.f32 %v964_v58 }
 0x253   : > { %v1181_v63 = vpop.eup %1180  ;;  %v753_v0 = vadd.f32 1.0, %v1179_v62  ;;  %1198 = vpow2.f32 %v967_v60  ;;  %v1073_v1 = vpop.f32.mrb[12].mxu1 }
 0x254   : > { %v1183_v2 = vpop.eup %1182  ;;  %v751_v3 = vadd.f32 1.0, %v1181_v63  ;;  %1200 = vpow2.f32 %v965_v61  ;;  %v693_v4 = vadd.f32 %v1073_v1, %v1639_v17  ;;  %v684_v5 = vpop.f32.mrb[13].mxu1 }
 0x255   : > { %v1185_v6 = vpop.eup %1184  ;;  %1202 = vrcp.f32 %v753_v0  ;;  %v754_v7 = vadd.f32 1.0, %v1183_v2  ;;  %v685_v8 = vadd.f32 %v1639_v17, %v684_v5  ;;  %v1074_v9 = vpop.f32.mrb[14].mxu1 }
 0x256   : > { %1204 = vrcp.f32 %v751_v3  ;;  %v752_v10 = vadd.f32 1.0, %v1185_v6  ;;  %v970_v11 = vmul.f32 -1.442695, %v693_v4  ;;  %v696_v12 = vadd.f32 %v1074_v9, %v1639_v17  ;;  %v687_v13 = vpop.f32.mrb[15].mxu1 }
 0x257   : > { %v1187_v14 = vpop.eup %1186  ;;  %1206 = vrcp.f32 %v754_v7  ;;  %v968_v15 = vmul.f32 -1.442695, %v685_v8  ;;  %v688_v16 = vadd.f32 %v1639_v17, %v687_v13 }
 0x258   : > { %v1189_v18 = vpop.eup %1188  ;;  %797 = vst [vmem:[%s1658_s28 + $0x10] sm:$0xff] %v1187_v14  ;;  %1208 = vrcp.f32 %v752_v10  ;;  %v971_v19 = vmul.f32 -1.442695, %v696_v12 }
 0x259   : > { %v1191_v20 = vpop.eup %1190  ;;  %795 = vst [vmem:[%s1658_s28] sm:$0xff] %v1189_v18  ;;  %1210 = vpow2.f32 %v970_v11  ;;  %v969_v21 = vmul.f32 -1.442695, %v688_v16 }
 0x25a   : > { %v1193_v22 = vpop.eup %1192  ;;  %798 = vst [vmem:[%s1658_s28 + $0x18] sm:$0xff] %v1191_v20  ;;  %1212 = vpow2.f32 %v968_v15 }
 0x25b   : > { %v1195_v23 = vpop.eup %1194  ;;  %796 = vst [vmem:[%s1658_s28 + $0x8] sm:$0xff] %v1193_v22  ;;  %1214 = vpow2.f32 %v971_v19 }
 0x25c   : > { %v1197_v17 = vpop.eup %1196  ;;  %v757_v24 = vadd.f32 1.0, %v1195_v23  ;;  %1216 = vpow2.f32 %v969_v21 }
 0x25d   : > { %v1199_v25 = vpop.eup %1198  ;;  %v755_v26 = vadd.f32 1.0, %v1197_v17 }
 0x25e   : > { %v1201_v27 = vpop.eup %1200  ;;  %1218 = vrcp.f32 %v757_v24  ;;  %v758_v28 = vadd.f32 1.0, %v1199_v25 }
 0x25f   : > { %v1203_v29 = vpop.eup %1202  ;;  %1220 = vrcp.f32 %v755_v26  ;;  %v756_v30 = vadd.f32 1.0, %v1201_v27 }
 0x260   : > { %v1205_v31 = vpop.eup %1204  ;;  %801 = vst [vmem:[%s1658_s28 + $0x30] sm:$0xff] %v1203_v29  ;;  %1222 = vrcp.f32 %v758_v28 }
 0x261   : > { %v1207_v32 = vpop.eup %1206  ;;  %799 = vst [vmem:[%s1658_s28 + $0x20] sm:$0xff] %v1205_v31  ;;  %1224 = vrcp.f32 %v756_v30 }
 0x262   : > { %v1209_v33 = vpop.eup %1208  ;;  %802 = vst [vmem:[%s1658_s28 + $0x38] sm:$0xff] %v1207_v32 }
 0x263   : > { %v1211_v34 = vpop.eup %1210  ;;  %800 = vst [vmem:[%s1658_s28 + $0x28] sm:$0xff] %v1209_v33 }
 0x264   : > { %v1213_v35 = vpop.eup %1212  ;;  %v761_v36 = vadd.f32 1.0, %v1211_v34 }
 0x265   : > { %v1215_v37 = vpop.eup %1214  ;;  %v759_v38 = vadd.f32 1.0, %v1213_v35 }
 0x266   : > { %v1217_v39 = vpop.eup %1216  ;;  %1226 = vrcp.f32 %v761_v36  ;;  %v762_v40 = vadd.f32 1.0, %v1215_v37 }
 0x267   : > { %1228 = vrcp.f32 %v759_v38  ;;  %v760_v41 = vadd.f32 1.0, %v1217_v39 }
 0x268   : > { %v1219_v42 = vpop.eup %1218  ;;  %1230 = vrcp.f32 %v762_v40 }
 0x269   : > { %v1221_v43 = vpop.eup %1220  ;;  %805 = vst [vmem:[%s1658_s28 + $0x50] sm:$0xff] %v1219_v42  ;;  %1232 = vrcp.f32 %v760_v41 }
 0x26a   : > { %v1223_v44 = vpop.eup %1222  ;;  %803 = vst [vmem:[%s1658_s28 + $0x40] sm:$0xff] %v1221_v43 }
 0x26b   : > { %v1225_v45 = vpop.eup %1224  ;;  %806 = vst [vmem:[%s1658_s28 + $0x58] sm:$0xff] %v1223_v44 }
 0x26c   : > { %804 = vst [vmem:[%s1658_s28 + $0x48] sm:$0xff] %v1225_v45 }
 0x270   : > { %v1227_v46 = vpop.eup %1226 }
 0x271   : > { %v1229_v47 = vpop.eup %1228  ;;  %809 = vst [vmem:[%s1658_s28 + $0x70] sm:$0xff] %v1227_v46 }
 0x272   : > { %v1231_v48 = vpop.eup %1230  ;;  %807 = vst [vmem:[%s1658_s28 + $0x60] sm:$0xff] %v1229_v47 }
 0x273   : > { %v1233_v49 = vpop.eup %1232  ;;  %810 = vst [vmem:[%s1658_s28 + $0x78] sm:$0xff] %v1231_v48 }
 0x274   : > { %808 = vst [vmem:[%s1658_s28 + $0x68] sm:$0xff] %v1233_v49 }
 0x275   : > { %1333 = shalt.err (!%p1330_p1)
}
 0x276   : > { %s1334_s24 = scalar_lea.hbm %s1678_s17, 2048  ;;  %s1338_s16 = scalar_lea.hbm %s1732_s5, 4096 }
 0x277   : > { %p1335_p13 = scmp.ne.s32.totalorder %s1678_s17, %s1334_s24  ;;  %p1339_p4 = scmp.lt.u32.totalorder %s1678_s17, %s1732_s5 }
 0x278   : > { %p1340_p5 = scmp.lt.u32.totalorder %s1338_s16, %s1334_s24  ;;  %p1342_p11 = scmp.lt.u32.totalorder %s1334_s24, %s1678_s17 }
 0x279   : > { %p1336_p6 = pnand %p1335_p13, %p1746_p0 }
 0x27a   : > { %p1341_p8 = por %p1340_p5, %p1339_p4 }
 0x27b   : > { %p1337_p10 = pneg %p1336_p6 }
 0x27c   : > { %p1343_p2 = por %p1342_p11, %p1341_p8 }
 0x27e   : > { %p1344_p3 = pnand %p1343_p2, %p1337_p10 }
 0x280   : > { %1347 = shalt.err (!%p1344_p3)
}
 0x281   : > { %s1398_s12 = smov 128   ;;  %s1399_s30 = smov 8  }
 0x282   : > { %1085 = dma.vmem_to_hbm [thread:$0]  (%p1746_p0), %s1680_s13, 2048, %s1678_s17, %s812_s22, %s1398_s12, %s1398_s12, %s1399_s30  }
 0x283 PF: > { %s840_s11 = sand.u32 1, %s1378_s18   ;;  %p1747_p7 = scmp.ne.s32.totalorder %s1737_s25, 0 }
 0x284   : > { %p1748_p9 = scmp.ge.s32.totalorder %s1390_s21, 2  ;;  %s841_s7 = scalar_lea.sflag [#allocation4], %s840_s11 }
 0x286   : > { %p1099_p12 = pnand %p1748_p9, %p1747_p7 }
 0x288   : > { %1373 = dma.done.wait (!%p1099_p12), %s841_s7, 2048  }
 0x289   : > { %1375 = vsyncadd (!%p1099_p12), %s841_s7, 4294965248  ;;  %p19_p1 = scmp.ge.s32.totalorder %s1546_s29, 4   ;;  %s1749_s18 = smov %s1382_s19 }
 0x28a   : > { %s1750_s19 = smov %s1386_s20  ;;  %s1751_s20 = smov %s1562_s27 }
 0x28b   : > { %s1752_s21 = smov %s1546_s29  ;;  %21 = sbr.rel (!%p19_p1) target bundleno = 6 (0x6), region = 93 }
 0x292   :  { %846 = vsyncpa [#allocation3], 1 }
 0x293   :  { %848 = vsyncpa [#allocation3 + $0x1], 1 }
 0x294   :  { %849 = vsyncpa [#allocation6], 1 }
 0x295   :  { %850 = vsyncpa [#allocation4], 1 }
 0x296   :  { %852 = vsyncpa [#allocation4 + $0x1], 1 }

</bundles_post_ra>
